<compile_context>
chip_gen: v5e
topology: v5e:2x2
jax: 0.10.0
libtpu: 0.0.40
codegen_flags: <defaults>
</compile_context>

<pallas_src>
import functools
import math

import jax
import jax.numpy as jnp
from jax.experimental import pallas as pl
from jax.experimental.pallas import tpu as pltpu

EPS = 1e-5  # BatchNorm1d eps


def _round_up(x, m):
    return (x + m - 1) // m * m


def linear_bn_kernel(x_ref, w_ref, g_ref, beta_ref, o_ref, acc_ref, *, inv_n):
    # x_ref:    [N_pad, tk]  bf16
    # w_ref:    [tn, tk]     bf16  (native [C_out, C_in] layout)
    # g_ref:    [1, tn]      f32   BN gamma
    # beta_ref: [1, tn]      f32   BN beta
    # o_ref:    [N_pad, tn]
    # acc_ref:  [N_pad, tn]  f32 scratch, resident across the K (reduction) axis
    k = pl.program_id(1)

    @pl.when(k == 0)
    def _():
        acc_ref[...] = jnp.zeros_like(acc_ref)

    # Contract the last dim of both operands (x @ W^T) on the MXU, f32 accumulate.
    acc_ref[...] += jax.lax.dot_general(
        x_ref[...], w_ref[...],
        dimension_numbers=(((1,), (1,)), ((), ())),
        preferred_element_type=jnp.float32,
    )

    @pl.when(k == pl.num_programs(1) - 1)
    def _():
        y = acc_ref[...]
        # Padded rows are exactly zero (zero-padded x, no bias), so plain column
        # sums over N_pad equal sums over the valid rows; divide by the true N.
        mean = jnp.sum(y, axis=0, keepdims=True) * inv_n
        mean_sq = jnp.sum(y * y, axis=0, keepdims=True) * inv_n
        var = jnp.maximum(mean_sq - mean * mean, 0.0)
        scale = jax.lax.rsqrt(var + EPS) * g_ref[...]
        o_ref[...] = ((y - mean) * scale + beta_ref[...]).astype(o_ref.dtype)


def linear_bn(x, weight, bias, gamma, beta):
    """LinearBN forward. x: [T, B, C_in] or [B, C_in]; weight: [C_out, C_in].

    `bias` is accepted for API parity with the PyTorch module but never reaches the
    kernel: training-mode BatchNorm cancels any per-channel shift exactly.
    """
    del bias  # mathematically a no-op under training-mode BN
    orig_shape = x.shape
    c_in = orig_shape[-1]
    c_out = weight.shape[0]
    x2 = x.reshape(-1, c_in)
    n = x2.shape[0]

    n_pad = _round_up(max(n, 8), 8)
    c_in_pad = _round_up(c_in, 128)
    c_out_pad = _round_up(c_out, 128)

    # MXU-aligned tiles: 256 lanes when divisible, else 128 (also fine on v5e).
    tk = 256 if c_in_pad % 256 == 0 else 128
    tn = 256 if c_out_pad % 256 == 0 else 128

    # NOTE: in production, the bf16 cast / zero-padding of the weight should be done
    # once outside the hot path; it is per-call here only to keep the demo simple.
    x_p = jnp.zeros((n_pad, c_in_pad), jnp.bfloat16).at[:n, :c_in].set(
        x2.astype(jnp.bfloat16))
    w_p = jnp.zeros((c_out_pad, c_in_pad), jnp.bfloat16).at[:c_out, :c_in].set(
        weight.astype(jnp.bfloat16))
    g_p = jnp.zeros((1, c_out_pad), jnp.float32).at[:, :c_out].set(
        gamma.astype(jnp.float32).reshape(1, c_out))
    b_p = jnp.zeros((1, c_out_pad), jnp.float32).at[:, :c_out].set(
        beta.astype(jnp.float32).reshape(1, c_out))

    grid = (c_out_pad // tn, c_in_pad // tk)  # (j: C_out tiles, k: C_in reduction)

    kernel = functools.partial(linear_bn_kernel, inv_n=1.0 / n)

    out = pl.pallas_call(
        kernel,
        out_shape=jax.ShapeDtypeStruct((n_pad, c_out_pad), x.dtype),
        grid_spec=pltpu.PrefetchScalarGridSpec(
            num_scalar_prefetch=0,
            grid=grid,
            in_specs=[
                pl.BlockSpec((n_pad, tk), lambda j, k: (0, k)),   # x
                pl.BlockSpec((tn, tk), lambda j, k: (j, k)),      # W (native layout)
                pl.BlockSpec((1, tn), lambda j, k: (0, j)),       # gamma
                pl.BlockSpec((1, tn), lambda j, k: (0, j)),       # beta
            ],
            out_specs=pl.BlockSpec((n_pad, tn), lambda j, k: (0, j)),
            scratch_shapes=[pltpu.VMEM((n_pad, tn), jnp.float32)],
        ),
        compiler_params=pltpu.CompilerParams(
            dimension_semantics=("parallel", "arbitrary"),
            vmem_limit_bytes=64 << 20,
        ),
    )(x_p, w_p, g_p, b_p)

    out = out[:n, :c_out]
    return out.reshape(orig_shape[:-1] + (c_out,))


def _reference_f32(x, weight, bias, gamma, beta):
    y = jnp.einsum("...i,oi->...o", x, weight) + bias
    y2 = y.reshape(-1, y.shape[-1])
    mean = jnp.mean(y2, axis=0)
    var = jnp.mean(jnp.square(y2 - mean), axis=0)
    out = (y2 - mean) / jnp.sqrt(var + EPS) * gamma + beta
    return out.reshape(y.shape)


def _reference_kernel_precision(x, weight, gamma, beta):
    # Same compute precision as the kernel: bf16 MXU operands, f32 accumulation/BN.
    x2 = x.reshape(-1, x.shape[-1]).astype(jnp.bfloat16)
    y = jax.lax.dot_general(
        x2, weight.astype(jnp.bfloat16),
        dimension_numbers=(((1,), (1,)), ((), ())),
        preferred_element_type=jnp.float32)
    mean = jnp.mean(y, axis=0)
    var = jnp.maximum(jnp.mean(y * y, axis=0) - mean * mean, 0.0)
    out = (y - mean) * jax.lax.rsqrt(var + EPS) * gamma + beta
    return out.reshape(x.shape[:-1] + (weight.shape[0],)).astype(x.dtype)


if __name__ == "__main__":
    T, B, C_IN, C_OUT = 8, 2, 32, 32

    key = jax.random.PRNGKey(0)
    k_w, k_b, k_g, k_bn, k_x, k_x2 = jax.random.split(key, 6)

    # PyTorch-style init.
    gain = 1.0                                              # calculate_gain('linear')
    bound_w = gain * math.sqrt(6.0 / (C_IN + C_OUT))        # xavier_uniform_
    weight = jax.random.uniform(k_w, (C_OUT, C_IN), jnp.float32, -bound_w, bound_w)
    bound_b = 1.0 / math.sqrt(C_IN)                         # default Linear bias init
    bias = jax.random.uniform(k_b, (C_OUT,), jnp.float32, -bound_b, bound_b)
    gamma = 1.0 + 0.1 * jax.random.normal(k_g, (C_OUT,), jnp.float32)   # BN weight
    beta = 0.1 * jax.random.normal(k_bn, (C_OUT,), jnp.float32)         # BN bias

    # 3-D input [T, B, C_in] (BN stats reduced jointly over T and B).
    x3 = jax.random.normal(k_x, (T, B, C_IN), jnp.float32)
    out3 = jax.block_until_ready(linear_bn(x3, weight, bias, gamma, beta))
    assert out3.shape == (T, B, C_OUT)
    ref3_kp = _reference_kernel_precision(x3, weight, gamma, beta)
    assert jnp.allclose(out3, ref3_kp, atol=1e-3, rtol=1e-3), \
        "mismatch vs kernel-precision reference (3D)"
    ref3_f32 = _reference_f32(x3, weight, bias, gamma, beta)
    assert jnp.allclose(out3, ref3_f32, atol=5e-2, rtol=5e-2), \
        "mismatch vs f32 reference (3D)"

    # 2-D input [B, C_in].
    x2 = jax.random.normal(k_x2, (4, C_IN), jnp.float32)
    out2 = jax.block_until_ready(linear_bn(x2, weight, bias, gamma, beta))
    assert out2.shape == (4, C_OUT)
    ref2_kp = _reference_kernel_precision(x2, weight, gamma, beta)
    assert jnp.allclose(out2, ref2_kp, atol=1e-3, rtol=1e-3), \
        "mismatch vs kernel-precision reference (2D)"

    print("KERNEL_OK")
</pallas_src>

<mosaic_0001>
module attributes {stable_mosaic.version = 11 : i64} {
  func.func @linear_bn_kernel(%arg0: i32, %arg1: i32, %arg2: memref<16x128xbf16, #tpu.memory_space<vmem>>, %arg3: memref<128x128xbf16, #tpu.memory_space<vmem>>, %arg4: memref<1x128xf32, #tpu.memory_space<vmem>>, %arg5: memref<1x128xf32, #tpu.memory_space<vmem>>, %arg6: memref<16x128xf32, #tpu.memory_space<vmem>>, %arg7: memref<16x128xf32, #tpu.memory_space<vmem>>) attributes {dimension_semantics = [#tpu.dimension_semantics<parallel>, #tpu.dimension_semantics<arbitrary>], iteration_bounds = array<i64: 1, 1>, scalar_prefetch = 0 : i64, scratch_operands = 1 : i64, tpu.core_type = #tpu.core_type<tc>, window_params = [{transform_indices = @transform_0, window_bounds = array<i64: 16, 128>}, {transform_indices = @transform_1, window_bounds = array<i64: 128, 128>}, {transform_indices = @transform_2, window_bounds = array<i64: 1, 128>}, {transform_indices = @transform_3, window_bounds = array<i64: 1, 128>}, {transform_indices = @transform_4, window_bounds = array<i64: 16, 128>}]} {
    %c0_i32 = arith.constant 0 : i32
    %0 = arith.cmpi eq, %arg1, %c0_i32 : i32
    %1 = arith.extui %0 : i1 to i32
    %c0_i32_0 = arith.constant 0 : i32
    %2 = arith.cmpi ne, %1, %c0_i32_0 : i32
    scf.if %2 {
      %cst_10 = arith.constant 0.000000e+00 : f32
      %12 = vector.broadcast %cst_10 : f32 to vector<16x128xf32>
      %c0_11 = arith.constant 0 : index
      %c0_12 = arith.constant 0 : index
      %13 = vector.load %arg7[%c0_11, %c0_12] : memref<16x128xf32, #tpu.memory_space<vmem>>, vector<16x128xf32>
      tpu.vector_store %arg7[%c0_11, %c0_12], %12 {strides = array<i32>} : memref<16x128xf32, #tpu.memory_space<vmem>>, vector<16x128xf32>,
    } else {
    }
    %c0 = arith.constant 0 : index
    %c0_1 = arith.constant 0 : index
    %3 = vector.load %arg7[%c0, %c0_1] : memref<16x128xf32, #tpu.memory_space<vmem>>, vector<16x128xf32>
    %c0_2 = arith.constant 0 : index
    %c0_3 = arith.constant 0 : index
    %4 = vector.load %arg2[%c0_2, %c0_3] : memref<16x128xbf16, #tpu.memory_space<vmem>>, vector<16x128xbf16>
    %c0_4 = arith.constant 0 : index
    %c0_5 = arith.constant 0 : index
    %5 = vector.load %arg3[%c0_4, %c0_5] : memref<128x128xbf16, #tpu.memory_space<vmem>>, vector<128x128xbf16>
    %cst = arith.constant dense<0.000000e+00> : vector<16x128xf32>
    %6 = tpu.matmul %4, %5, %cst {dimension_numbers = #tpu.dot_dimension_numbers<[1], [1], [0], [0], [0, 0, 1, 0], [], []>} : vector<16x128xbf16>, vector<128x128xbf16>, vector<16x128xf32> -> vector<16x128xf32>
    %7 = arith.addf %3, %6 : vector<16x128xf32>
    %c0_6 = arith.constant 0 : index
    %c0_7 = arith.constant 0 : index
    %8 = vector.load %arg7[%c0_6, %c0_7] : memref<16x128xf32, #tpu.memory_space<vmem>>, vector<16x128xf32>
    tpu.vector_store %arg7[%c0_6, %c0_7], %7 {strides = array<i32>} : memref<16x128xf32, #tpu.memory_space<vmem>>, vector<16x128xf32>,
    %c0_i32_8 = arith.constant 0 : i32
    %9 = arith.cmpi eq, %arg1, %c0_i32_8 : i32
    %10 = arith.extui %9 : i1 to i32
    %c0_i32_9 = arith.constant 0 : i32
    %11 = arith.cmpi ne, %10, %c0_i32_9 : i32
    scf.if %11 {
      %c0_10 = arith.constant 0 : index
      %c0_11 = arith.constant 0 : index
      %12 = vector.load %arg7[%c0_10, %c0_11] : memref<16x128xf32, #tpu.memory_space<vmem>>, vector<16x128xf32>
      %cst_12 = arith.constant dense<0.000000e+00> : vector<128xf32>
      %13 = vector.multi_reduction <add>, %12, %cst_12 [0] : vector<16x128xf32> to vector<128xf32>
      %14 = vector.shape_cast %13 : vector<128xf32> to vector<1x128xf32>
      %cst_13 = arith.constant 6.250000e-02 : f32
      %15 = vector.broadcast %cst_13 : f32 to vector<1x128xf32>
      %16 = arith.mulf %14, %15 : vector<1x128xf32>
      %17 = arith.mulf %12, %12 : vector<16x128xf32>
      %cst_14 = arith.constant dense<0.000000e+00> : vector<128xf32>
      %18 = vector.multi_reduction <add>, %17, %cst_14 [0] : vector<16x128xf32> to vector<128xf32>
      %19 = vector.shape_cast %18 : vector<128xf32> to vector<1x128xf32>
      %cst_15 = arith.constant 6.250000e-02 : f32
      %20 = vector.broadcast %cst_15 : f32 to vector<1x128xf32>
      %21 = arith.mulf %19, %20 : vector<1x128xf32>
      %22 = arith.mulf %16, %16 : vector<1x128xf32>
      %23 = arith.subf %21, %22 : vector<1x128xf32>
      %cst_16 = arith.constant 0.000000e+00 : f32
      %24 = vector.broadcast %cst_16 : f32 to vector<1x128xf32>
      %25 = arith.maximumf %23, %24 : vector<1x128xf32>
      %cst_17 = arith.constant 9.99999974E-6 : f32
      %26 = vector.broadcast %cst_17 : f32 to vector<1x128xf32>
      %27 = arith.addf %25, %26 : vector<1x128xf32>
      %28 = math.rsqrt %27 : vector<1x128xf32>
      %c0_18 = arith.constant 0 : index
      %c0_19 = arith.constant 0 : index
      %29 = vector.load %arg4[%c0_18, %c0_19] : memref<1x128xf32, #tpu.memory_space<vmem>>, vector<1x128xf32>
      %30 = arith.mulf %28, %29 : vector<1x128xf32>
      %31 = vector.broadcast %16 : vector<1x128xf32> to vector<16x128xf32>
      %32 = arith.subf %12, %31 : vector<16x128xf32>
      %33 = vector.broadcast %30 : vector<1x128xf32> to vector<16x128xf32>
      %34 = arith.mulf %32, %33 : vector<16x128xf32>
      %c0_20 = arith.constant 0 : index
      %c0_21 = arith.constant 0 : index
      %35 = vector.load %arg5[%c0_20, %c0_21] : memref<1x128xf32, #tpu.memory_space<vmem>>, vector<1x128xf32>
      %36 = vector.broadcast %35 : vector<1x128xf32> to vector<16x128xf32>
      %37 = arith.addf %34, %36 : vector<16x128xf32>
      %c0_22 = arith.constant 0 : index
      %c0_23 = arith.constant 0 : index
      %38 = vector.load %arg6[%c0_22, %c0_23] : memref<16x128xf32, #tpu.memory_space<vmem>>, vector<16x128xf32>
      tpu.vector_store %arg6[%c0_22, %c0_23], %37 {strides = array<i32>} : memref<16x128xf32, #tpu.memory_space<vmem>>, vector<16x128xf32>,
    } else {
    }
    return
  }
  func.func @transform_0(%arg0: i32, %arg1: i32) -> (i32, i32) {
    %c0_i32 = arith.constant 0 : i32
    %c0_i32_0 = arith.constant 0 : i32
    return %c0_i32, %arg1 : i32, i32
  }
  func.func @transform_1(%arg0: i32, %arg1: i32) -> (i32, i32) {
    %c0_i32 = arith.constant 0 : i32
    return %arg0, %arg1 : i32, i32
  }
  func.func @transform_2(%arg0: i32, %arg1: i32) -> (i32, i32) {
    %c0_i32 = arith.constant 0 : i32
    %c0_i32_0 = arith.constant 0 : i32
    return %c0_i32, %arg0 : i32, i32
  }
  func.func @transform_3(%arg0: i32, %arg1: i32) -> (i32, i32) {
    %c0_i32 = arith.constant 0 : i32
    %c0_i32_0 = arith.constant 0 : i32
    return %c0_i32, %arg0 : i32, i32
  }
  func.func @transform_4(%arg0: i32, %arg1: i32) -> (i32, i32) {
    %c0_i32 = arith.constant 0 : i32
    %c0_i32_0 = arith.constant 0 : i32
    return %c0_i32, %arg0 : i32, i32
  }
}

</mosaic_0001>

<bundles_post_ra>
// kernel: tpu_custom_call.1
= control target key start
LH: loop header
LB: loop body
LE: loop exit
PB: predicated region body
PF: predicated region fallthrough
CT: control target
= control target key end

     0   :  { %9 = vsyncpa [#allocation4], 0  ;;  %s400_s0 = inlined_call_operand.hbm [shape: bf16[16,128], index: 0, kind: input, shape index: {}]   ;;  %s401_s1 = inlined_call_operand.hbm [shape: bf16[128,128], index: 1, kind: input, shape index: {}]   ;;  %s402_s2 = inlined_call_operand.vmem [shape: f32[1,128], index: 2, kind: input, shape index: {}]   ;;  %s403_s3 = inlined_call_operand.vmem [shape: f32[1,128], index: 3, kind: input, shape index: {}]   ;;  %s404_s4 = inlined_call_operand.hbm [shape: f32[16,128], index: 4, kind: output, shape index: {}]  }
   0x1   :  { %10 = vsyncpa [#allocation7], 0 }
   0x2   :  { %11 = vsyncpa [#allocation5], 0  ;;  %s16_s17 = sshll.u32 %s400_s0, 4  ;;  %s353_s18 = smov [#allocation3]   ;;  %s17_s17 = int_to_ptr.hbm [resolvable:$true] %s16_s17 }
   0x3   :  { %s18_s19 = sshll.u32 %s353_s18, 4  ;;  %s29_s22 = sshll.u32 %s401_s1, 4  ;;  %s19_s19 = int_to_ptr.vmem [resolvable:$true] %s18_s19  ;;  %s30_s22 = int_to_ptr.hbm [resolvable:$true] %s29_s22 }
   0x4   :  { %s354_s23 = smov 64   ;;  %s355_s24 = smov 4  }
   0x5   :  { %24 = dma.hbm_to_vmem [thread:$0]  %s17_s17, 128, %s19_s19, [#allocation4], %s354_s23, %s354_s23, %s355_s24  }
   0x6   :  { %s356_s25 = smov [#allocation6]  }
   0x7   :  { %s31_s26 = sshll.u32 %s356_s25, 4  ;;  %s32_s26 = int_to_ptr.vmem [resolvable:$true] %s31_s26 }
   0x8   :  { %37 = dma.hbm_to_vmem [thread:$0]  %s30_s22, 1024, %s32_s26, [#allocation7], %s354_s23, %s354_s23, %s355_s24  }
   0x9   :  { %347 = dma.done.wait [#allocation4], 128  }
   0xa   :  { %348 = vsyncadd [#allocation4], 4294967168 }
   0xb   :  { %349 = dma.done.wait [#allocation7], 1024  }
   0xc   :  { %350 = vsyncadd [#allocation7], 4294966272  ;;  %v264_v0 = vld [vmem:[#allocation6 + $0x38] sm:$0xff]  ;;  %v263_v1 = vld [vmem:[#allocation6 + $0x30] sm:$0xff]  ;;  %s357_s29 = smov [#allocation8]   ;;  %s206_s7 = sshll.u32 %s404_s4, 4  ;;  %s207_s7 = int_to_ptr.hbm [resolvable:$true] %s206_s7 }
   0xd   :  { %130 = vmatpush.bf16.xpose.msra.mxu0 %v264_v0  ;;  %v262_v2 = vld [vmem:[#allocation6 + $0x28] sm:$0xff]  ;;  %v261_v3 = vld [vmem:[#allocation6 + $0x20] sm:$0xff]  ;;  %v260_v4 = vld [vmem:[#allocation6 + $0x18] sm:$0xff]  ;;  %s204_s30 = sshll.u32 %s357_s29, 4  ;;  %s359_s8 = smov 8   ;;  %s205_s30 = int_to_ptr.vmem [resolvable:$true] %s204_s30 }
   0xe   :  { %v259_v5 = vld [vmem:[#allocation6 + $0x10] sm:$0xff]  ;;  %v258_v6 = vld [vmem:[#allocation6 + $0x8] sm:$0xff]  ;;  %v257_v7 = vld [vmem:[#allocation6] sm:$0xff] }
   0xf   :  { %v256_v8 = vld [vmem:[#allocation3] sm:$0xff] }
  0x10   :  { %v185_v39 = vld [vmem:[%s402_s2] sm:$0x1]  ;;  %s358_s2 = smov 128  }
  0x11   :  { %v272_v45 = vld [vmem:[%s403_s3] ss:$0 sm:$0xff] }
  0x15   :  { %131 = vmatpush.bf16.xpose.msra.mxu0 %v263_v1 }
  0x1d   :  { %132 = vmatpush.bf16.xpose.msra.mxu0 %v262_v2 }
  0x25   :  { %133 = vmatpush.bf16.xpose.msra.mxu0 %v261_v3 }
  0x2d   :  { %134 = vmatpush.bf16.xpose.msra.mxu0 %v260_v4 }
  0x35   :  { %135 = vmatpush.bf16.xpose.msra.mxu0 %v259_v5 }
  0x3d   :  { %136 = vmatpush.bf16.xpose.msra.mxu0 %v258_v6 }
  0x45   :  { %137 = vmatpush.bf16.xpose.msra.mxu0 %v257_v7 }
  0x4c   :  { %138 = vmatmul.bf16.vlgmr.msra.gmra.mxu0 %v256_v8 }
  0xc9   :  { %v139_v9 = vpop.f32.mrf.mxu0 }
  0xca   :  { %v161_v11 = vmul.f32 %v139_v9, %v139_v9 }
  0xd1   :  { %v141_v10 = vpop.f32.mrf.mxu0 }
  0xd2   :  { %v153_v12 = vadd.f32 %v141_v10, %v139_v9  ;;  %v162_v13 = vmul.f32 %v141_v10, %v141_v10 }
  0xd4   :  { %v154_v14 = vrot.slane %v153_v12, 4  ;;  %v163_v15 = vadd.f32 %v162_v13, %v161_v11 }
  0xd6   :  { %v155_v16 = vadd.f32 %v154_v14, %v153_v12  ;;  %v164_v17 = vrot.slane %v163_v15, 4 }
  0xd8   :  { %v156_v18 = vrot.slane %v155_v16, 2  ;;  %v165_v19 = vadd.f32 %v164_v17, %v163_v15 }
  0xda   :  { %v157_v20 = vadd.f32 %v156_v18, %v155_v16  ;;  %v166_v21 = vrot.slane %v165_v19, 2 }
  0xdc   :  { %v158_v22 = vrot.slane %v157_v20, 1  ;;  %v167_v23 = vadd.f32 %v166_v21, %v165_v19 }
  0xde   :  { %v159_v24 = vadd.f32 %v158_v22, %v157_v20  ;;  %v168_v25 = vrot.slane %v167_v23, 1 }
  0xe0   :  { %v160_v26 = vmul.f32 0.0625, %v159_v24  ;;  %v169_v27 = vadd.f32 %v168_v25, %v167_v23 }
  0xe2   :  { %v170_v28 = vmul.f32 0.0625, %v169_v27  ;;  %v171_v29 = vmul.f32 %v160_v26, %v160_v26  ;;  %v187_v42 = vsub.f32 %v139_v9, %v160_v26  ;;  %v188_v43 = vsub.f32 %v141_v10, %v160_v26 }
  0xe4   :  { %v172_v30 = vsub.f32 %v170_v28, %v171_v29 }
  0xe6   :  { %v173_v31 = vmax.f32 %v172_v30, 0.0 }
  0xe8   :  { %v174_v32 = vadd.f32 1e-05, %v173_v31 }
  0xea   :  { %273 = vrsqrt.f32 %v174_v32  ;;  %vm181_vm1 = vweird.f32 %v174_v32 }
  0xf0   :  { %v274_v33 = vpop.eup %273 }
  0xf1   :  { %v176_v34 = vmul.f32 %v274_v33, %v174_v32  ;;  %vm182_vm0 = vweird.f32 %v274_v33 }
  0xf2   :  { %vm183_vm2 = vmor %vm181_vm1, %vm182_vm0 }
  0xf3   :  { %v177_v35 = vmul.f32 %v274_v33, %v176_v34 }
  0xf5   :  { %v178_v36 = vmul.f32 0.5, %v177_v35 }
  0xf7   :  { %v179_v37 = vsub.f32 1.5, %v178_v36 }
  0xf9   :  { %v180_v38 = vmul.f32 %v274_v33, %v179_v37 }
  0xfb   :  { %v184_v40 = vsel %vm183_vm2, %v274_v33, %v180_v38 }
  0xfc   :  { %v186_v41 = vmul.f32 %v185_v39, %v184_v40 }
  0xfe   :  { %v189_v44 = vperm.slane %v186_v41, 0 }
 0x100   :  { %v190_v46 = vmul.f32 %v189_v44, %v187_v42  ;;  %v191_v47 = vmul.f32 %v189_v44, %v188_v43 }
 0x102   :  { %v196_v48 = vadd.f32 %v272_v45, %v190_v46  ;;  %v197_v49 = vadd.f32 %v272_v45, %v191_v47 }
 0x104   :  { %199 = vst [vmem:[#allocation8 + $0x8] sm:$0xff] %v197_v49 }
 0x105   :  { %198 = vst [vmem:[#allocation8] sm:$0xff] %v196_v48 }
 0x106   :  { %212 = dma.vmem_to_hbm [thread:$0]  %s205_s30, 256, %s207_s7, [#allocation5], %s358_s2, %s358_s2, %s359_s8  }
 0x107   :  { %351 = dma.done.wait [#allocation5], 256  }
 0x108   :  { %352 = vsyncadd [#allocation5], 4294967040 }
 0x109   :  { %217 = vsyncpa [#allocation4], 1 }
 0x10a   :  { %218 = vsyncpa [#allocation7], 1 }
 0x10b   :  { %219 = vsyncpa [#allocation5], 1 }

</bundles_post_ra>
